<compile_context>
chip_gen: v6e
topology: v6e:2x2x1
jax: 0.10.0
libtpu: 0.0.40
codegen_flags: <defaults>
</compile_context>

<pallas_src>
import jax
import jax.numpy as jnp
from jax.experimental import pallas as pl
from jax.experimental.pallas import tpu as pltpu


def _round_up(x: int, m: int) -> int:
    return (x + m - 1) // m * m


def residual_mlp_kernel(x_ref, w1_ref, b1_ref, w2_ref, b2_ref, o_ref, acc_ref):
    # Grid: (batch tiles [parallel], hidden tiles [arbitrary / reduction]).
    j = pl.program_id(1)

    @pl.when(j == 0)
    def _():
        acc_ref[...] = jnp.zeros_like(acc_ref)

    x = x_ref[...]
    # Layer 1, this hidden slice: ReLU(x @ W1[:, j*t:(j+1)*t] + b1_slice).
    h = jnp.dot(x.astype(w1_ref.dtype), w1_ref[...],
                preferred_element_type=jnp.float32)
    h = jnp.maximum(h + b1_ref[...], 0.0).astype(w2_ref.dtype)  # -> bf16 now
    # Layer 2 partial sum over the hidden slice, accumulated in f32.
    acc_ref[...] += jnp.dot(h, w2_ref[...], preferred_element_type=jnp.float32)

    @pl.when(j == pl.num_programs(1) - 1)
    def _():
        y = acc_ref[...] + b2_ref[...]
        # Residual connection in f32 with the un-rounded x.
        o_ref[...] = (x.astype(jnp.float32) + y).astype(o_ref.dtype)


def _vmem_bytes(tb: int, hp: int, t_hm: int, out_isz: int, x_isz: int) -> int:
    """Conservative VMEM footprint (pipeline blocks counted double-buffered)."""
    return (2 * tb * hp * x_isz                 # x tile
            + 2 * tb * hp * out_isz             # out tile
            + tb * hp * 4                       # f32 accumulator scratch
            + 2 * 2 * (hp * t_hm + t_hm * hp)   # W1 + W2 (bf16), double-buffered
            + 2 * 4 * (t_hm + hp)               # b1 + b2 (f32), double-buffered
            + 6 * tb * t_hm)                    # live hidden activation (f32+bf16)


def _vmem_budget() -> int:
    try:
        cap = int(pltpu.get_tpu_info().vmem_capacity_bytes)
    except Exception:
        cap = 64 * 1024 * 1024                  # conservative: v7x per-core VMEM
    return cap - cap // 8                       # ~56 MiB v7x, ~112 MiB v5e/v6e


def residual_mlp(x, w1, b1, w2, b2, *, block_b: int = 512, hidden_block=None):
    """y = x + ReLU(x @ w1 + b1) @ w2 + b2, fused in a single Pallas TPU kernel."""
    B, H = x.shape
    Hm = w1.shape[1]
    assert w1.shape == (H, Hm) and w2.shape == (Hm, H)
    assert b1.shape == (1, Hm) and b2.shape == (1, H)

    # Lane-dense feature padding (zero padding keeps the math exact).
    Hp = _round_up(H, 128)
    Hmp = _round_up(Hm, 128)
    out_isz = x.dtype.itemsize
    x_isz = x.dtype.itemsize

    # ---- Batch tiling: no pad / output slice on the batch axis.  The last
    # tile may be partial (rows are independent; OOB rows are masked on store).
    # Keep >= 2 tiles whenever possible so both v7x TensorCores are used.
    if B <= 8:
        tb = B
    else:
        n_b = max(2, pl.cdiv(B, block_b))
        tb = _round_up(pl.cdiv(B, n_b), 8)

    budget = _vmem_budget()

    # ---- Hidden (Hm) tiling: weights stay VMEM-resident when they fit the
    # budget; otherwise split the reduction axis (exact: padded hidden units
    # are zero, and partial sums are accumulated in f32).
    if hidden_block is not None:
        t_hm = min(_round_up(int(hidden_block), 128), Hmp)
        while Hmp % t_hm != 0:          # must divide the (padded) hidden dim
            t_hm -= 128
    else:
        candidates = [d for d in range(Hmp, 127, -128) if Hmp % d == 0]
        t_hm = candidates[-1]           # 128 always divides Hmp
        for d in candidates:
            if _vmem_bytes(tb, Hp, d, out_isz, x_isz) <= budget:
                t_hm = d
                break

    # If even the smallest hidden tile is too large, shrink the batch tile.
    while _vmem_bytes(tb, Hp, t_hm, out_isz, x_isz) > budget and tb > 8:
        tb = max(8, _round_up(tb // 2, 8))

    n_b = pl.cdiv(B, tb)
    n_hm = Hmp // t_hm

    # ---- Pad operands (feature axes only; weights are small and reused).
    xp = x if Hp == H else jnp.pad(x, ((0, 0), (0, Hp - H)))
    w1p = jnp.pad(w1, ((0, Hp - H), (0, Hmp - Hm))).astype(jnp.bfloat16)
    w2p = jnp.pad(w2, ((0, Hmp - Hm), (0, Hp - H))).astype(jnp.bfloat16)
    b1p = jnp.pad(b1, ((0, 0), (0, Hmp - Hm))).astype(jnp.float32)
    b2p = jnp.pad(b2, ((0, 0), (0, Hp - H))).astype(jnp.float32)

    vmem_needed = _vmem_bytes(tb, Hp, t_hm, out_isz, x_isz)
    vmem_limit = int(min(budget, max(vmem_needed + (4 << 20), 32 << 20)))

    weight_bytes = (w1p.size + w2p.size) * 2 + (b1p.size + b2p.size) * 4
    cost = pl.CostEstimate(
        flops=4 * B * Hp * Hmp,
        transcendentals=0,
        bytes_accessed=(xp.size + B * Hp) * x_isz
                       + weight_bytes * (n_b if n_hm > 1 else 1))

    out = pl.pallas_call(
        residual_mlp_kernel,
        out_shape=jax.ShapeDtypeStruct((B, Hp), x.dtype),
        grid_spec=pltpu.PrefetchScalarGridSpec(
            num_scalar_prefetch=0,
            grid=(n_b, n_hm),
            in_specs=[
                pl.BlockSpec((tb, Hp), lambda i, j: (i, 0)),    # x: batch tile
                pl.BlockSpec((Hp, t_hm), lambda i, j: (0, j)),  # W1 hidden slice
                pl.BlockSpec((1, t_hm), lambda i, j: (0, j)),   # b1 hidden slice
                pl.BlockSpec((t_hm, Hp), lambda i, j: (j, 0)),  # W2 hidden slice
                pl.BlockSpec((1, Hp), lambda i, j: (0, 0)),     # b2: resident
            ],
            out_specs=pl.BlockSpec((tb, Hp), lambda i, j: (i, 0)),
            scratch_shapes=[pltpu.VMEM((tb, Hp), jnp.float32)],  # f32 accumulator
        ),
        compiler_params=pltpu.CompilerParams(
            dimension_semantics=("parallel", "arbitrary"),
            vmem_limit_bytes=vmem_limit),
        cost_estimate=cost,
    )(xp, w1p, b1p, w2p, b2p)

    return out if Hp == H else out[:, :H]


def residual_mlp_ref(x, w1, b1, w2, b2):
    """Pure-JAX reference with the same bf16 rounding points, f32 accumulation."""
    hi = jax.lax.Precision.HIGHEST
    bf = lambda a: a.astype(jnp.bfloat16).astype(jnp.float32)
    h = jnp.maximum(jnp.dot(bf(x), bf(w1), precision=hi) + b1, 0.0)
    y = jnp.dot(bf(h), bf(w2), precision=hi) + b2
    return x + y


if __name__ == "__main__":
    key = jax.random.PRNGKey(0)
    k_x, k_w1, k_b1, k_w2, k_b2 = jax.random.split(key, 5)

    def make(batch, hidden, hidden_mid):
        x = jax.random.normal(k_x, (batch, hidden), dtype=jnp.float32)
        w1 = jax.random.normal(k_w1, (hidden, hidden_mid), jnp.float32) * 0.1
        b1 = jax.random.normal(k_b1, (1, hidden_mid), jnp.float32) * 0.1
        w2 = jax.random.normal(k_w2, (hidden_mid, hidden), jnp.float32) * 0.1
        b2 = jax.random.normal(k_b2, (1, hidden), jnp.float32) * 0.1
        return x, w1, b1, w2, b2

    # 1) Small, unaligned shapes: exercises feature zero-padding (single tile).
    args = make(6, 32, 48)
    y = jax.block_until_ready(residual_mlp(*args))
    y_ref = residual_mlp_ref(*args)
    assert y.shape == y_ref.shape
    assert jnp.allclose(y, y_ref, atol=1e-2, rtol=1e-2), "mismatch (unaligned)"

    # 2) Partial last batch tile + forced hidden split: exercises the masked
    #    batch store and the f32-accumulator reduction path (pl.when init/fin).
    args = make(100, 128, 256)
    y = jax.block_until_ready(
        residual_mlp(*args, block_b=64, hidden_block=128))
    y_ref = residual_mlp_ref(*args)
    assert jnp.allclose(y, y_ref, atol=1e-2, rtol=1e-2), "mismatch (tiled path)"

    # 3) Default path: >=2 batch tiles (megacore), weights fully resident.
    args = make(256, 128, 256)
    y = jax.block_until_ready(residual_mlp(*args))
    y_ref = residual_mlp_ref(*args)
    assert jnp.allclose(y, y_ref, atol=1e-2, rtol=1e-2), "mismatch (resident)"

    print("KERNEL_OK")
</pallas_src>

<mosaic_0001>
module attributes {stable_mosaic.version = 11 : i64} {
  func.func @residual_mlp_kernel(%arg0: i32, %arg1: i32, %arg2: memref<6x128xf32, #tpu.memory_space<vmem>>, %arg3: memref<128x128xbf16, #tpu.memory_space<vmem>>, %arg4: memref<1x128xf32, #tpu.memory_space<vmem>>, %arg5: memref<128x128xbf16, #tpu.memory_space<vmem>>, %arg6: memref<1x128xf32, #tpu.memory_space<vmem>>, %arg7: memref<6x128xf32, #tpu.memory_space<vmem>>, %arg8: memref<6x128xf32, #tpu.memory_space<vmem>>) attributes {dimension_semantics = [#tpu.dimension_semantics<parallel>, #tpu.dimension_semantics<arbitrary>], iteration_bounds = array<i64: 1, 1>, scalar_prefetch = 0 : i64, scratch_operands = 1 : i64, tpu.core_type = #tpu.core_type<tc>, window_params = [{transform_indices = @transform_0, window_bounds = array<i64: 6, 128>}, {transform_indices = @transform_1, window_bounds = array<i64: 128, 128>}, {transform_indices = @transform_2, window_bounds = array<i64: 1, 128>}, {transform_indices = @transform_3, window_bounds = array<i64: 128, 128>}, {pipeline_mode = #tpu.pipeline_mode<synchronous>, transform_indices = @transform_4, window_bounds = array<i64: 1, 128>}, {transform_indices = @transform_5, window_bounds = array<i64: 6, 128>}]} {
    %c0_i32 = arith.constant 0 : i32
    %0 = arith.cmpi eq, %arg1, %c0_i32 : i32
    %1 = arith.extui %0 : i1 to i32
    %c0_i32_0 = arith.constant 0 : i32
    %2 = arith.cmpi ne, %1, %c0_i32_0 : i32
    scf.if %2 {
      %cst_16 = arith.constant 0.000000e+00 : f32
      %21 = vector.broadcast %cst_16 : f32 to vector<6x128xf32>
      %c0_17 = arith.constant 0 : index
      %c0_18 = arith.constant 0 : index
      %22 = vector.load %arg8[%c0_17, %c0_18] : memref<6x128xf32, #tpu.memory_space<vmem>>, vector<6x128xf32>
      tpu.vector_store %arg8[%c0_17, %c0_18], %21 {strides = array<i32>} : memref<6x128xf32, #tpu.memory_space<vmem>>, vector<6x128xf32>,
    } else {
    }
    %c0 = arith.constant 0 : index
    %c0_1 = arith.constant 0 : index
    %3 = vector.load %arg2[%c0, %c0_1] : memref<6x128xf32, #tpu.memory_space<vmem>>, vector<6x128xf32>
    %4 = arith.truncf %3 : vector<6x128xf32> to vector<6x128xbf16>
    %c0_2 = arith.constant 0 : index
    %c0_3 = arith.constant 0 : index
    %5 = vector.load %arg3[%c0_2, %c0_3] : memref<128x128xbf16, #tpu.memory_space<vmem>>, vector<128x128xbf16>
    %cst = arith.constant dense<0.000000e+00> : vector<6x128xf32>
    %6 = tpu.matmul %4, %5, %cst {dimension_numbers = #tpu.dot_dimension_numbers<[1], [0], [0], [1], [0, 0, 1, 1], [], []>} : vector<6x128xbf16>, vector<128x128xbf16>, vector<6x128xf32> -> vector<6x128xf32>
    %c0_4 = arith.constant 0 : index
    %c0_5 = arith.constant 0 : index
    %7 = vector.load %arg4[%c0_4, %c0_5] : memref<1x128xf32, #tpu.memory_space<vmem>>, vector<1x128xf32>
    %8 = vector.broadcast %7 : vector<1x128xf32> to vector<6x128xf32>
    %9 = arith.addf %6, %8 : vector<6x128xf32>
    %cst_6 = arith.constant 0.000000e+00 : f32
    %10 = vector.broadcast %cst_6 : f32 to vector<6x128xf32>
    %11 = arith.maximumf %9, %10 : vector<6x128xf32>
    %12 = arith.truncf %11 : vector<6x128xf32> to vector<6x128xbf16>
    %c0_7 = arith.constant 0 : index
    %c0_8 = arith.constant 0 : index
    %13 = vector.load %arg8[%c0_7, %c0_8] : memref<6x128xf32, #tpu.memory_space<vmem>>, vector<6x128xf32>
    %c0_9 = arith.constant 0 : index
    %c0_10 = arith.constant 0 : index
    %14 = vector.load %arg5[%c0_9, %c0_10] : memref<128x128xbf16, #tpu.memory_space<vmem>>, vector<128x128xbf16>
    %cst_11 = arith.constant dense<0.000000e+00> : vector<6x128xf32>
    %15 = tpu.matmul %12, %14, %cst_11 {dimension_numbers = #tpu.dot_dimension_numbers<[1], [0], [0], [1], [0, 0, 1, 1], [], []>} : vector<6x128xbf16>, vector<128x128xbf16>, vector<6x128xf32> -> vector<6x128xf32>
    %16 = arith.addf %13, %15 : vector<6x128xf32>
    %c0_12 = arith.constant 0 : index
    %c0_13 = arith.constant 0 : index
    %17 = vector.load %arg8[%c0_12, %c0_13] : memref<6x128xf32, #tpu.memory_space<vmem>>, vector<6x128xf32>
    tpu.vector_store %arg8[%c0_12, %c0_13], %16 {strides = array<i32>} : memref<6x128xf32, #tpu.memory_space<vmem>>, vector<6x128xf32>,
    %c0_i32_14 = arith.constant 0 : i32
    %18 = arith.cmpi eq, %arg1, %c0_i32_14 : i32
    %19 = arith.extui %18 : i1 to i32
    %c0_i32_15 = arith.constant 0 : i32
    %20 = arith.cmpi ne, %19, %c0_i32_15 : i32
    scf.if %20 {
      %c0_16 = arith.constant 0 : index
      %c0_17 = arith.constant 0 : index
      %21 = vector.load %arg8[%c0_16, %c0_17] : memref<6x128xf32, #tpu.memory_space<vmem>>, vector<6x128xf32>
      %c0_18 = arith.constant 0 : index
      %c0_19 = arith.constant 0 : index
      %22 = vector.load %arg6[%c0_18, %c0_19] : memref<1x128xf32, #tpu.memory_space<vmem>>, vector<1x128xf32>
      %23 = vector.broadcast %22 : vector<1x128xf32> to vector<6x128xf32>
      %24 = arith.addf %21, %23 : vector<6x128xf32>
      %25 = arith.addf %3, %24 : vector<6x128xf32>
      %c0_20 = arith.constant 0 : index
      %c0_21 = arith.constant 0 : index
      %26 = vector.load %arg7[%c0_20, %c0_21] : memref<6x128xf32, #tpu.memory_space<vmem>>, vector<6x128xf32>
      tpu.vector_store %arg7[%c0_20, %c0_21], %25 {strides = array<i32>} : memref<6x128xf32, #tpu.memory_space<vmem>>, vector<6x128xf32>,
    } else {
    }
    return
  }
  func.func @transform_0(%arg0: i32, %arg1: i32) -> (i32, i32) {
    %c0_i32 = arith.constant 0 : i32
    %c0_i32_0 = arith.constant 0 : i32
    return %arg0, %c0_i32 : i32, i32
  }
  func.func @transform_1(%arg0: i32, %arg1: i32) -> (i32, i32) {
    %c0_i32 = arith.constant 0 : i32
    %c0_i32_0 = arith.constant 0 : i32
    return %c0_i32, %arg1 : i32, i32
  }
  func.func @transform_2(%arg0: i32, %arg1: i32) -> (i32, i32) {
    %c0_i32 = arith.constant 0 : i32
    %c0_i32_0 = arith.constant 0 : i32
    return %c0_i32, %arg1 : i32, i32
  }
  func.func @transform_3(%arg0: i32, %arg1: i32) -> (i32, i32) {
    %c0_i32 = arith.constant 0 : i32
    %c0_i32_0 = arith.constant 0 : i32
    return %arg1, %c0_i32 : i32, i32
  }
  func.func @transform_4(%arg0: i32, %arg1: i32) -> (i32, i32) {
    %c0_i32 = arith.constant 0 : i32
    %c0_i32_0 = arith.constant 0 : i32
    %c0_i32_1 = arith.constant 0 : i32
    return %c0_i32, %c0_i32_0 : i32, i32
  }
  func.func @transform_5(%arg0: i32, %arg1: i32) -> (i32, i32) {
    %c0_i32 = arith.constant 0 : i32
    %c0_i32_0 = arith.constant 0 : i32
    return %arg0, %c0_i32 : i32, i32
  }
}

</mosaic_0001>

<bundles_post_ra>
// kernel: tpu_custom_call.1
= control target key start
LH: loop header
LB: loop body
LE: loop exit
PB: predicated region body
PF: predicated region fallthrough
CT: control target
= control target key end

     0   :  { %10 = vsyncpa [#allocation4], 0  ;;  %s560_s0 = inlined_call_operand.hbm [shape: f32[6,128], index: 0, kind: input, shape index: {}]   ;;  %s561_s1 = inlined_call_operand.hbm [shape: bf16[128,128], index: 1, kind: input, shape index: {}]   ;;  %s562_s2 = inlined_call_operand.vmem [shape: f32[1,128], index: 2, kind: input, shape index: {}]   ;;  %s563_s3 = inlined_call_operand.hbm [shape: bf16[128,128], index: 3, kind: input, shape index: {}]   ;;  %s564_s4 = inlined_call_operand.vmem [shape: f32[1,128], index: 4, kind: input, shape index: {}]   ;;  %s565_s5 = inlined_call_operand.hbm [shape: f32[6,128], index: 5, kind: output, shape index: {}]  }
   0x1   :  { %11 = vsyncpa [#allocation7], 0 }
   0x2   :  { %12 = vsyncpa [#allocation5], 0  ;;  %s504_s18 = smov [#allocation6]  }
   0x3   :  { %s28_s19 = sshll.u32 %s504_s18, 4  ;;  %s29_s19 = int_to_ptr.vmem [resolvable:$true] %s28_s19 }
   0x4   :  { %s426_s20 = scalar_lea.vmem %s29_s19, 1024  ;;  %p431_p1 = scmp.lt.s32.totalorder %s29_s19, %s29_s19 }
   0x5   :  { %p427_p0 = scmp.ne.s32.totalorder %s29_s19, %s426_s20  ;;  %p432_p2 = scmp.lt.s32.totalorder %s426_s20, %s426_s20 }
   0x7   :  { %p433_p3 = por %p432_p2, %p431_p1 }
   0x9   :  { %p434_p4 = pnand %p433_p3, %p427_p0 }
   0xb   :  { %437 = shalt.err (!%p434_p4)
}
   0xc   :  { %s505_s21 = smov 64   ;;  %s506_s22 = smov 4  }
   0xd   :  { %34 = dma.hbm_to_vmem [thread:$0]  %s561_s1, 1024, %s29_s19, [#allocation7], %s505_s21, %s505_s21, %s506_s22  }
   0xe   :  { %s507_s25 = smov [#allocation3]   ;;  %s508_s27 = smov [#allocation8]  }
   0xf   :  { %s19_s26 = sshll.u32 %s507_s25, 4  ;;  %s42_s28 = sshll.u32 %s508_s27, 4  ;;  %s20_s26 = int_to_ptr.vmem [resolvable:$true] %s19_s26  ;;  %s43_s28 = int_to_ptr.vmem [resolvable:$true] %s42_s28 }
  0x10   :  { %s446_s29 = scalar_lea.vmem %s20_s26, 128  ;;  %p451_p6 = scmp.lt.s32.totalorder %s20_s26, %s20_s26 }
  0x11   :  { %p447_p5 = scmp.ne.s32.totalorder %s20_s26, %s446_s29  ;;  %p452_p7 = scmp.lt.s32.totalorder %s446_s29, %s446_s29 }
  0x13   :  { %p453_p8 = por %p452_p7, %p451_p6 }
  0x15   :  { %p454_p9 = pnand %p453_p8, %p447_p5 }
  0x17   :  { %457 = shalt.err (!%p454_p9)
}
  0x18   :  { %22 = dma.hbm_to_vmem [thread:$0]  %s560_s0, 128, %s20_s26, [#allocation4]  }
  0x19   :  { %s466_s7 = scalar_lea.vmem %s43_s28, 1024  ;;  %p471_p11 = scmp.lt.s32.totalorder %s43_s28, %s43_s28 }
  0x1a   :  { %p467_p10 = scmp.ne.s32.totalorder %s43_s28, %s466_s7  ;;  %p472_p12 = scmp.lt.s32.totalorder %s466_s7, %s466_s7 }
  0x1c   :  { %p473_p13 = por %p472_p12, %p471_p11 }
  0x1e   :  { %p474_p0 = pnand %p473_p13, %p467_p10 }
  0x20   :  { %477 = shalt.err (!%p474_p0)
}
  0x21   :  { %48 = dma.hbm_to_vmem [thread:$0]  %s563_s3, 1024, %s43_s28, [#allocation7], %s505_s21, %s505_s21, %s506_s22  }
  0x22   :  { %498 = dma.done.wait [#allocation4], 128  }
  0x23   :  { %499 = vsyncadd [#allocation4], 4294967168 }
  0x24   :  { %500 = dma.done.wait [#allocation7], 2048  }
  0x25   :  { %501 = vsyncadd [#allocation7], 4294965248  ;;  %v509_v0 = vmov 0.0   ;;  %vm510_vm0 = vmmov 0   ;;  %v402_v1 = vld [vmem:[#allocation6 + $0x38] sm:$0xff]   ;;  %v403_v2 = vld [vmem:[#allocation6 + $0x30] sm:$0xff]  }
  0x26   :  { %354 = vmatprep.subr.bf16.mxu0 %v509_v0  ;;  %65 = vst [vmem:[#allocation2] sm:$0x3f] %v509_v0  ;;  %370 = vmatprep.mubr.msk.bf16.mxu0 %vm510_vm0, %v509_v0  ;;  %v404_v3 = vld [vmem:[#allocation6 + $0x28] sm:$0xff]   ;;  %v410_v4 = vld [vmem:[#allocation8 + $0x38] sm:$0xff]   ;;  %v405_v5 = vld [vmem:[#allocation6 + $0x20] sm:$0xff]  }
  0x27   :  { %374 = vmatprep.subr.bf16.mxu1 %v509_v0  ;;  %390 = vmatprep.mubr.msk.bf16.mxu1 %vm510_vm0, %v509_v0  ;;  %v411_v6 = vld [vmem:[#allocation8 + $0x30] sm:$0xff]   ;;  %v406_v7 = vld [vmem:[#allocation6 + $0x18] sm:$0xff]   ;;  %v412_v8 = vld [vmem:[#allocation8 + $0x28] sm:$0xff]  }
  0x28   :  { %355 = vmatpush3.bf16.msra.mxu0 %v402_v1  ;;  %375 = vmatpush3.bf16.msra.mxu1 %v410_v4  ;;  %v407_v9 = vld [vmem:[#allocation6 + $0x10] sm:$0xff]   ;;  %v413_v10 = vld [vmem:[#allocation8 + $0x20] sm:$0xff]   ;;  %v408_v11 = vld [vmem:[#allocation6 + $0x8] sm:$0xff]  }
  0x29   :  { %356 = vmatprep.subr.bf16.mxu0 %v509_v0  ;;  %376 = vmatprep.subr.bf16.mxu1 %v509_v0  ;;  %v414_v12 = vld [vmem:[#allocation8 + $0x18] sm:$0xff]   ;;  %v409_v13 = vld [vmem:[#allocation6] sm:$0xff]   ;;  %v415_v15 = vld [vmem:[#allocation8 + $0x10] sm:$0xff]  }
  0x2a   :  { %v66_v14 = vld [vmem:[#allocation3] sm:$0x3f]  ;;  %v416_v17 = vld [vmem:[#allocation8 + $0x8] sm:$0xff]   ;;  %v417_v18 = vld [vmem:[#allocation8] sm:$0xff]  }
  0x2b   :  { %v67_v16 = vpack.c.bf16 %v66_v14, %v66_v14  ;;  %v318_v19 = vld [vmem:[%s562_s2] ss:$0 sm:$0xff]  ;;  %s511_s2 = smov [#allocation9]  }
  0x2c   :  { %357 = vmatpush3.bf16.msra.mxu0 %v403_v2  ;;  %377 = vmatpush3.bf16.msra.mxu1 %v411_v6  ;;  %v335_v33 = vld [vmem:[%s564_s4] ss:$0 sm:$0xff]  ;;  %s308_s11 = sshll.u32 %s511_s2, 4  ;;  %s309_s11 = int_to_ptr.vmem [resolvable:$true] %s308_s11 }
  0x2d   :  { %358 = vmatprep.subr.bf16.mxu0 %v509_v0  ;;  %378 = vmatprep.subr.bf16.mxu1 %v509_v0  ;;  %v181_v27 = vld [vmem:[#allocation2] sm:$0x3f]  ;;  %s478_s12 = scalar_lea.vmem %s309_s11, 128  ;;  %p483_p2 = scmp.lt.s32.totalorder %s309_s11, %s309_s11 }
  0x2e   :  { %p479_p1 = scmp.ne.s32.totalorder %s309_s11, %s478_s12  ;;  %p484_p3 = scmp.lt.s32.totalorder %s478_s12, %s478_s12 }
  0x30   :  { %359 = vmatpush3.bf16.msra.mxu0 %v404_v3  ;;  %379 = vmatpush3.bf16.msra.mxu1 %v412_v8  ;;  %p485_p4 = por %p484_p3, %p483_p2 }
  0x31   :  { %360 = vmatprep.subr.bf16.mxu0 %v509_v0  ;;  %380 = vmatprep.subr.bf16.mxu1 %v509_v0 }
  0x32   :  { %p486_p5 = pnand %p485_p4, %p479_p1 }
  0x34   :  { %361 = vmatpush3.bf16.msra.mxu0 %v405_v5  ;;  %381 = vmatpush3.bf16.msra.mxu1 %v413_v10 }
  0x35   :  { %362 = vmatprep.subr.bf16.mxu0 %v509_v0  ;;  %382 = vmatprep.subr.bf16.mxu1 %v509_v0 }
  0x38   :  { %363 = vmatpush3.bf16.msra.mxu0 %v406_v7  ;;  %383 = vmatpush3.bf16.msra.mxu1 %v414_v12 }
  0x39   :  { %364 = vmatprep.subr.bf16.mxu0 %v509_v0  ;;  %384 = vmatprep.subr.bf16.mxu1 %v509_v0 }
  0x3c   :  { %365 = vmatpush3.bf16.msra.mxu0 %v407_v9  ;;  %385 = vmatpush3.bf16.msra.mxu1 %v415_v15 }
  0x3d   :  { %366 = vmatprep.subr.bf16.mxu0 %v509_v0  ;;  %386 = vmatprep.subr.bf16.mxu1 %v509_v0 }
  0x40   :  { %367 = vmatpush3.bf16.msra.mxu0 %v408_v11  ;;  %387 = vmatpush3.bf16.msra.mxu1 %v416_v17 }
  0x41   :  { %368 = vmatprep.subr.bf16.mxu0 %v509_v0  ;;  %388 = vmatprep.subr.bf16.mxu1 %v509_v0 }
  0x44   :  { %369 = vmatpush3.bf16.msra.mxu0 %v409_v13  ;;  %389 = vmatpush3.bf16.msra.mxu1 %v417_v18 }
  0x47   :  { %371 = vmatmul.mubr.bf16.vlgmr.msra.gmra.mxu0 %v67_v16 }
 0x107   :  { %v173_v20 = vpop.f32.mrf.mxu0 }
 0x108   :  { %v174_v21 = vadd.f32 %v318_v19, %v173_v20 }
 0x109   :  { %v372_v22 = vpop.f32.mrf.mxu0 }
 0x10a   :  { %v179_v23 = vmax.f32 %v174_v21, 0.0 }
 0x10b   :  { %v176_v24 = vpop.f32.mrf.mxu0 }
 0x10c   :  { %v180_v25 = vpack.c.bf16 %v179_v23, %v179_v23 }
 0x10d   :  { %v373_v26 = vpop.f32.mrf.mxu0 }
 0x10e   :  { %391 = vmatmul.mubr.bf16.vlgmr.msra.gmra.mxu1 %v180_v25 }
 0x1ce   :  { %v280_v28 = vpop.f32.mrf.mxu1 }
 0x1cf   :  { %v286_v29 = vadd.f32 %v280_v28, %v181_v27 }
 0x1d0   :  { %v392_v30 = vpop.f32.mrf.mxu1 }
 0x1d1   :  { %287 = vst [vmem:[#allocation2] sm:$0x3f] %v286_v29 }
 0x1d2   :  { %v283_v31 = vpop.f32.mrf.mxu1 }
 0x1d4   :  { %v393_v32 = vpop.f32.mrf.mxu1 }
 0x1d8   :  { %v291_v34 = vld [vmem:[#allocation2] sm:$0x3f] }
 0x1d9   :  { %v299_v35 = vadd.f32 %v335_v33, %v291_v34 }
 0x1db   :  { %v300_v36 = vadd.f32 %v299_v35, %v66_v14 }
 0x1dd   :  { %301 = vst [vmem:[#allocation9] sm:$0x3f] %v300_v36 }
 0x1de   :  { %489 = shalt.err (!%p486_p5)
}
 0x1df   :  { %311 = dma.vmem_to_hbm [thread:$0]  %s309_s11, 128, %s565_s5, [#allocation5]  }
 0x1e0   :  { %502 = dma.done.wait [#allocation5], 128  }
 0x1e1   :  { %503 = vsyncadd [#allocation5], 4294967168 }
 0x1e2   :  { %315 = vsyncpa [#allocation4], 1 }
 0x1e3   :  { %316 = vsyncpa [#allocation7], 1 }
 0x1e4   :  { %317 = vsyncpa [#allocation5], 1 }

</bundles_post_ra>
